<compile_context>
chip_gen: v7x
topology: tpu7x:2x2x1
jax: 0.10.0
libtpu: 0.0.40
codegen_flags: <defaults>
</compile_context>

<pallas_src>
import functools

import jax
import jax.numpy as jnp
from jax.experimental import pallas as pl
from jax.experimental.pallas import tpu as pltpu


def _round_up(x, m):
    return ((x + m - 1) // m) * m


def _cdiv(a, b):
    return -(-a // b)


def _mlp_softmax_kernel(n_layers, activation, *refs):
    """refs = (x_ref, W0, b0, W1, b1, ..., out_ref). One batch tile per call.

    Padded logit columns were pre-masked to -1e30 via the padded last-layer
    bias in the wrapper, so no in-kernel column masking is required.
    """
    x_ref = refs[0]
    out_ref = refs[-1]
    param_refs = refs[1:-1]
    assert len(param_refs) == 2 * n_layers

    h = x_ref[...]  # matmul dtype (bf16 or f32)
    for i in range(n_layers):
        w_ref = param_refs[2 * i]
        b_ref = param_refs[2 * i + 1]
        # torch.mm(logits, W) + b ; f32 accumulation on the MXU.
        z = jnp.dot(h.astype(w_ref.dtype), w_ref[...],
                    preferred_element_type=jnp.float32)
        z = z + b_ref[...].astype(jnp.float32)
        h = activation(z) if i < n_layers - 1 else z  # f32

    # Numerically stable softmax over dim=1 (rows), f32 throughout.
    m = jnp.max(h, axis=1, keepdims=True)
    e = jnp.exp(h - m)
    denom = jnp.sum(e, axis=1, keepdims=True)
    inv = pl.reciprocal(denom, approx=True)   # EUP slot (frees the VALU)
    inv = inv * (2.0 - denom * inv)           # one Newton step -> ~exact 1/denom
    out_ref[...] = (e * inv).astype(out_ref.dtype)


def pt_deep_forward(x, weights, biases,
                    activation=lambda t: jnp.maximum(t, 0.0),
                    matmul_dtype=jnp.bfloat16,
                    out_dtype=jnp.float32,
                    tile_rows=1024):
    """Pallas implementation of PTDeep.forward.

    Args:
      x: [N, layer_units[0]] float32 input.
      weights: list of [in, out] float32 weight matrices.
      biases: list of [1, out] float32 bias rows.
      activation: elementwise hidden activation (default ReLU).
      matmul_dtype: dtype fed to the MXU (jnp.bfloat16 recommended; f32 ok).
      out_dtype: dtype of the returned probabilities.
      tile_rows: max batch-tile size (rows per grid step).
    Returns:
      probs: [N, layer_units[-1]] out_dtype, rows sum to 1.
    """
    n_layers = len(weights)
    assert len(biases) == n_layers
    n_rows, d_in = x.shape
    dims = [d_in] + [w.shape[1] for w in weights]
    n_out = dims[-1]

    # Lane-align every layer width to 128 (MXU / vreg friendly).
    dims_p = [_round_up(d, 128) for d in dims]

    itemsize_mm = jnp.dtype(matmul_dtype).itemsize
    itemsize_out = jnp.dtype(out_dtype).itemsize

    # ---- Pad parameters. Padded weight rows/cols are zero; padded columns of
    # the LAST layer's bias are -1e30 so the softmax ignores them. ----
    params_flat = []
    for i, (W, b) in enumerate(zip(weights, biases)):
        in_p, out_p = dims_p[i], dims_p[i + 1]
        W_p = jnp.zeros((in_p, out_p), matmul_dtype)
        W_p = W_p.at[: W.shape[0], : W.shape[1]].set(W.astype(matmul_dtype))
        pad_fill = -1e30 if (i == n_layers - 1 and out_p > dims[i + 1]) else 0.0
        b_p = jnp.full((1, out_p), pad_fill, jnp.float32)
        b_p = b_p.at[:, : b.shape[1]].set(b.astype(jnp.float32))
        params_flat.extend([W_p, b_p])

    # ---- VMEM accounting: resident params (single-buffered) + per-row bytes
    # for the streamed input/output tiles (double-buffered) and the widest
    # live (h, z) f32 pair (+ the bf16 cast of h on the bf16 path). ----
    param_bytes = (sum(dims_p[i] * dims_p[i + 1] * itemsize_mm
                       for i in range(n_layers))
                   + sum(dims_p[i + 1] * 4 for i in range(n_layers)))
    live_row_bytes = max(dims_p[i] + dims_p[i + 1] for i in range(n_layers)) * 4
    if itemsize_mm < 4:
        live_row_bytes += max(dims_p[:-1]) * itemsize_mm
    act_row_bytes = (2 * dims_p[0] * itemsize_mm
                     + 2 * dims_p[-1] * itemsize_out
                     + live_row_bytes)

    # Per-TensorCore budget safe on v7x (64 MiB/TC) and trivially on v5e/v6e.
    vmem_budget = 40 * 1024 * 1024
    avail = vmem_budget - param_bytes
    if avail < 16 * act_row_bytes:
        # TODO(synk): stream oversized layers' weights from HBM (pl.ANY +
        # pltpu.emit_pipeline + f32 accumulator) instead of VMEM residency.
        raise NotImplementedError(
            "resident weights exceed the per-core VMEM budget; "
            "HBM-streamed K-tiling is not implemented")
    tm_cap = max(16, (avail // act_row_bytes) // 16 * 16)

    # ---- Balanced batch tiling: avoid up-to-2x padding, and keep >= 2 tiles
    # when the batch allows so the 'parallel' axis can use both v7x cores. ----
    tm_target = max(16, min(tile_rows, tm_cap))
    n_tiles = max(1, _cdiv(n_rows, tm_target))
    if n_rows > 16:
        n_tiles = max(n_tiles, 2)
    tm = _round_up(_cdiv(n_rows, n_tiles), 16)
    tm = max(16, min(tm, tm_cap))
    n_pad = _round_up(n_rows, tm)
    grid = (n_pad // tm,)

    x_p = jnp.zeros((n_pad, dims_p[0]), matmul_dtype)
    x_p = x_p.at[:n_rows, :d_in].set(x.astype(matmul_dtype))

    # Scoped-VMEM limit from the real footprint (2x params covers the
    # double-buffered fallback), clipped to v7x's 64 MiB per-core physical.
    footprint = 2 * param_bytes + tm * act_row_bytes + 4 * 1024 * 1024
    vmem_limit = int(min(64 * 1024 * 1024, max(32 * 1024 * 1024, footprint)))

    kernel = functools.partial(_mlp_softmax_kernel, n_layers, activation)

    flops = 2 * n_pad * sum(dims_p[i] * dims_p[i + 1] for i in range(n_layers))
    bytes_accessed = int(x_p.size * x_p.dtype.itemsize
                         + sum(p.size * p.dtype.itemsize for p in params_flat)
                         + n_pad * dims_p[-1] * itemsize_out)
    transcendentals = n_pad * dims_p[-1]  # softmax exp

    def _build(single_buffer_params):
        in_specs = [pl.BlockSpec((tm, dims_p[0]), lambda i: (i, 0))]
        for li in range(n_layers):
            in_p, out_p = dims_p[li], dims_p[li + 1]
            if single_buffer_params:
                in_specs.append(pl.BlockSpec((in_p, out_p), lambda i: (0, 0),
                                             pipeline_mode=pl.Buffered(1)))
                in_specs.append(pl.BlockSpec((1, out_p), lambda i: (0, 0),
                                             pipeline_mode=pl.Buffered(1)))
            else:
                in_specs.append(pl.BlockSpec((in_p, out_p), lambda i: (0, 0)))
                in_specs.append(pl.BlockSpec((1, out_p), lambda i: (0, 0)))
        out_spec = pl.BlockSpec((tm, dims_p[-1]), lambda i: (i, 0))
        return pl.pallas_call(
            kernel,
            out_shape=jax.ShapeDtypeStruct((n_pad, dims_p[-1]), out_dtype),
            grid=grid,
            in_specs=in_specs,
            out_specs=out_spec,
            compiler_params=pltpu.CompilerParams(
                dimension_semantics=("parallel",),
                vmem_limit_bytes=vmem_limit),
            cost_estimate=pl.CostEstimate(
                flops=int(flops),
                transcendentals=int(transcendentals),
                bytes_accessed=bytes_accessed),
        )

    try:
        out = _build(single_buffer_params=True)(x_p, *params_flat)
    except Exception:
        # pl.Buffered(1) not supported on this jax build -> default buffering.
        out = _build(single_buffer_params=False)(x_p, *params_flat)

    return out[:n_rows, :n_out]


def init_pt_deep_params(key, layer_units):
    """Mirror PTDeep.__init__: W ~ U[0,1) (in, out), b = zeros((1, out))."""
    weights, biases = [], []
    for i in range(1, len(layer_units)):
        key, wkey = jax.random.split(key)
        W = jax.random.uniform(
            wkey, (layer_units[i - 1], layer_units[i]), dtype=jnp.float32)
        b = jnp.zeros((1, layer_units[i]), dtype=jnp.float32)
        weights.append(W)
        biases.append(b)
    return weights, biases


def _reference_forward(x, weights, biases, cast_dtype=None):
    """Plain-JAX reference. If cast_dtype is given, inputs/weights/hidden
    activations are rounded through that dtype (matches the bf16 MXU path)."""
    def maybe_cast(a):
        if cast_dtype is None:
            return a
        return a.astype(cast_dtype).astype(jnp.float32)

    h = maybe_cast(x)
    for i, (W, b) in enumerate(zip(weights, biases)):
        h = h @ maybe_cast(W) + b
        if i < len(weights) - 1:
            h = jnp.maximum(h, 0.0)
            h = maybe_cast(h)
    m = jnp.max(h, axis=1, keepdims=True)
    e = jnp.exp(h - m)
    return e / jnp.sum(e, axis=1, keepdims=True)


if __name__ == "__main__":
    key = jax.random.PRNGKey(0)

    # layer_units = [D_in, hidden, n_classes]; activation = ReLU
    layer_units = [16, 32, 10]
    batch = 8

    key, xkey = jax.random.split(key)
    x = jax.random.normal(xkey, (batch, layer_units[0]), dtype=jnp.float32)
    weights, biases = init_pt_deep_params(key, layer_units)

    # --- f32 MXU path: close parity with the PyTorch math. ---
    probs = pt_deep_forward(x, weights, biases, matmul_dtype=jnp.float32)
    probs = jax.block_until_ready(probs)
    ref = _reference_forward(x, weights, biases)
    assert probs.shape == (batch, layer_units[-1])
    assert jnp.allclose(probs, ref, atol=2e-3, rtol=2e-3)
    assert jnp.allclose(jnp.sum(probs, axis=1), 1.0, atol=1e-3)

    # --- default bf16-fed MXU path (recommended on v5e/v6e/v7x): compare
    #     against a reference with identically bf16-rounded operands. ---
    probs_bf16 = pt_deep_forward(x, weights, biases)  # matmul_dtype=bf16
    probs_bf16 = jax.block_until_ready(probs_bf16)
    ref_bf16 = _reference_forward(x, weights, biases, cast_dtype=jnp.bfloat16)
    assert probs_bf16.shape == (batch, layer_units[-1])
    assert jnp.allclose(probs_bf16, ref_bf16, atol=5e-3, rtol=5e-3)
    assert jnp.allclose(jnp.sum(probs_bf16, axis=1), 1.0, atol=2e-3)

    print("KERNEL_OK")
</pallas_src>

<mosaic_0001>
module attributes {stable_mosaic.version = 11 : i64} {
  func.func @_mlp_softmax_kernel(%arg0: i32, %arg1: memref<16x128xf32, #tpu.memory_space<vmem>>, %arg2: memref<128x128xf32, #tpu.memory_space<vmem>>, %arg3: memref<1x128xf32, #tpu.memory_space<vmem>>, %arg4: memref<128x128xf32, #tpu.memory_space<vmem>>, %arg5: memref<1x128xf32, #tpu.memory_space<vmem>>, %arg6: memref<16x128xf32, #tpu.memory_space<vmem>>) attributes {dimension_semantics = [#tpu.dimension_semantics<parallel>], iteration_bounds = array<i64: 1>, scalar_prefetch = 0 : i64, scratch_operands = 0 : i64, tpu.core_type = #tpu.core_type<tc>, window_params = [{transform_indices = @transform_0, window_bounds = array<i64: 16, 128>}, {pipeline_mode = #tpu.pipeline_mode<synchronous>, transform_indices = @transform_1, window_bounds = array<i64: 128, 128>}, {pipeline_mode = #tpu.pipeline_mode<synchronous>, transform_indices = @transform_2, window_bounds = array<i64: 1, 128>}, {pipeline_mode = #tpu.pipeline_mode<synchronous>, transform_indices = @transform_3, window_bounds = array<i64: 128, 128>}, {pipeline_mode = #tpu.pipeline_mode<synchronous>, transform_indices = @transform_4, window_bounds = array<i64: 1, 128>}, {transform_indices = @transform_5, window_bounds = array<i64: 16, 128>}]} {
    %c0 = arith.constant 0 : index
    %c0_0 = arith.constant 0 : index
    %0 = vector.load %arg1[%c0, %c0_0] : memref<16x128xf32, #tpu.memory_space<vmem>>, vector<16x128xf32>
    %c0_1 = arith.constant 0 : index
    %c0_2 = arith.constant 0 : index
    %1 = vector.load %arg2[%c0_1, %c0_2] : memref<128x128xf32, #tpu.memory_space<vmem>>, vector<128x128xf32>
    %cst = arith.constant dense<0.000000e+00> : vector<16x128xf32>
    %2 = tpu.matmul %0, %1, %cst {dimension_numbers = #tpu.dot_dimension_numbers<[1], [0], [0], [1], [0, 0, 1, 1], [], []>} : vector<16x128xf32>, vector<128x128xf32>, vector<16x128xf32> -> vector<16x128xf32>
    %c0_3 = arith.constant 0 : index
    %c0_4 = arith.constant 0 : index
    %3 = vector.load %arg3[%c0_3, %c0_4] : memref<1x128xf32, #tpu.memory_space<vmem>>, vector<1x128xf32>
    %4 = vector.broadcast %3 : vector<1x128xf32> to vector<16x128xf32>
    %5 = arith.addf %2, %4 : vector<16x128xf32>
    %cst_5 = arith.constant 0.000000e+00 : f32
    %6 = vector.broadcast %cst_5 : f32 to vector<16x128xf32>
    %7 = arith.maximumf %5, %6 : vector<16x128xf32>
    %c0_6 = arith.constant 0 : index
    %c0_7 = arith.constant 0 : index
    %8 = vector.load %arg4[%c0_6, %c0_7] : memref<128x128xf32, #tpu.memory_space<vmem>>, vector<128x128xf32>
    %cst_8 = arith.constant dense<0.000000e+00> : vector<16x128xf32>
    %9 = tpu.matmul %7, %8, %cst_8 {dimension_numbers = #tpu.dot_dimension_numbers<[1], [0], [0], [1], [0, 0, 1, 1], [], []>} : vector<16x128xf32>, vector<128x128xf32>, vector<16x128xf32> -> vector<16x128xf32>
    %c0_9 = arith.constant 0 : index
    %c0_10 = arith.constant 0 : index
    %10 = vector.load %arg5[%c0_9, %c0_10] : memref<1x128xf32, #tpu.memory_space<vmem>>, vector<1x128xf32>
    %11 = vector.broadcast %10 : vector<1x128xf32> to vector<16x128xf32>
    %12 = arith.addf %9, %11 : vector<16x128xf32>
    %cst_11 = arith.constant dense<0xFF800000> : vector<16xf32>
    %13 = vector.multi_reduction <maximumf>, %12, %cst_11 [1] : vector<16x128xf32> to vector<16xf32>
    %14 = vector.shape_cast %13 : vector<16xf32> to vector<16x1xf32>
    %15 = vector.broadcast %14 : vector<16x1xf32> to vector<16x128xf32>
    %16 = arith.subf %12, %15 : vector<16x128xf32>
    %17 = math.exp %16 : vector<16x128xf32>
    %cst_12 = arith.constant dense<0.000000e+00> : vector<16xf32>
    %18 = vector.multi_reduction <add>, %17, %cst_12 [1] : vector<16x128xf32> to vector<16xf32>
    %19 = vector.shape_cast %18 : vector<16xf32> to vector<16x1xf32>
    %20 = tpu.reciprocal %19 {approx = true} : vector<16x1xf32> -> vector<16x1xf32>
    %21 = arith.mulf %19, %20 : vector<16x1xf32>
    %cst_13 = arith.constant 2.000000e+00 : f32
    %22 = vector.broadcast %cst_13 : f32 to vector<16x1xf32>
    %23 = arith.subf %22, %21 : vector<16x1xf32>
    %24 = arith.mulf %20, %23 : vector<16x1xf32>
    %25 = vector.broadcast %24 : vector<16x1xf32> to vector<16x128xf32>
    %26 = arith.mulf %17, %25 : vector<16x128xf32>
    %c0_14 = arith.constant 0 : index
    %c0_15 = arith.constant 0 : index
    %27 = vector.load %arg6[%c0_14, %c0_15] : memref<16x128xf32, #tpu.memory_space<vmem>>, vector<16x128xf32>
    tpu.vector_store %arg6[%c0_14, %c0_15], %26 {strides = array<i32>} : memref<16x128xf32, #tpu.memory_space<vmem>>, vector<16x128xf32>,
    return
  }
  func.func @transform_0(%arg0: i32) -> (i32, i32) {
    %c0_i32 = arith.constant 0 : i32
    %c0_i32_0 = arith.constant 0 : i32
    return %arg0, %c0_i32 : i32, i32
  }
  func.func @transform_1(%arg0: i32) -> (i32, i32) {
    %c0_i32 = arith.constant 0 : i32
    %c0_i32_0 = arith.constant 0 : i32
    %c0_i32_1 = arith.constant 0 : i32
    return %c0_i32, %c0_i32_0 : i32, i32
  }
  func.func @transform_2(%arg0: i32) -> (i32, i32) {
    %c0_i32 = arith.constant 0 : i32
    %c0_i32_0 = arith.constant 0 : i32
    %c0_i32_1 = arith.constant 0 : i32
    return %c0_i32, %c0_i32_0 : i32, i32
  }
  func.func @transform_3(%arg0: i32) -> (i32, i32) {
    %c0_i32 = arith.constant 0 : i32
    %c0_i32_0 = arith.constant 0 : i32
    %c0_i32_1 = arith.constant 0 : i32
    return %c0_i32, %c0_i32_0 : i32, i32
  }
  func.func @transform_4(%arg0: i32) -> (i32, i32) {
    %c0_i32 = arith.constant 0 : i32
    %c0_i32_0 = arith.constant 0 : i32
    %c0_i32_1 = arith.constant 0 : i32
    return %c0_i32, %c0_i32_0 : i32, i32
  }
  func.func @transform_5(%arg0: i32) -> (i32, i32) {
    %c0_i32 = arith.constant 0 : i32
    %c0_i32_0 = arith.constant 0 : i32
    return %arg0, %c0_i32 : i32, i32
  }
}

module attributes {stable_mosaic.version = 11 : i64} {
  func.func @_mlp_softmax_kernel(%arg0: i32, %arg1: memref<16x128xf32, #tpu.memory_space<vmem>>, %arg2: memref<128x128xf32, #tpu.memory_space<vmem>>, %arg3: memref<1x128xf32, #tpu.memory_space<vmem>>, %arg4: memref<128x128xf32, #tpu.memory_space<vmem>>, %arg5: memref<1x128xf32, #tpu.memory_space<vmem>>, %arg6: memref<16x128xf32, #tpu.memory_space<vmem>>) attributes {dimension_semantics = [#tpu.dimension_semantics<parallel>], iteration_bounds = array<i64: 1>, scalar_prefetch = 0 : i64, scratch_operands = 0 : i64, tpu.core_type = #tpu.core_type<tc>, window_params = [{transform_indices = @transform_0, window_bounds = array<i64: 16, 128>}, {pipeline_mode = #tpu.pipeline_mode<synchronous>, transform_indices = @transform_1, window_bounds = array<i64: 128, 128>}, {pipeline_mode = #tpu.pipeline_mode<synchronous>, transform_indices = @transform_2, window_bounds = array<i64: 1, 128>}, {pipeline_mode = #tpu.pipeline_mode<synchronous>, transform_indices = @transform_3, window_bounds = array<i64: 128, 128>}, {pipeline_mode = #tpu.pipeline_mode<synchronous>, transform_indices = @transform_4, window_bounds = array<i64: 1, 128>}, {transform_indices = @transform_5, window_bounds = array<i64: 16, 128>}]} {
    %c0 = arith.constant 0 : index
    %c0_0 = arith.constant 0 : index
    %0 = vector.load %arg1[%c0, %c0_0] : memref<16x128xf32, #tpu.memory_space<vmem>>, vector<16x128xf32>
    %c0_1 = arith.constant 0 : index
    %c0_2 = arith.constant 0 : index
    %1 = vector.load %arg2[%c0_1, %c0_2] : memref<128x128xf32, #tpu.memory_space<vmem>>, vector<128x128xf32>
    %cst = arith.constant dense<0.000000e+00> : vector<16x128xf32>
    %2 = tpu.matmul %0, %1, %cst {dimension_numbers = #tpu.dot_dimension_numbers<[1], [0], [0], [1], [0, 0, 1, 1], [], []>} : vector<16x128xf32>, vector<128x128xf32>, vector<16x128xf32> -> vector<16x128xf32>
    %c0_3 = arith.constant 0 : index
    %c0_4 = arith.constant 0 : index
    %3 = vector.load %arg3[%c0_3, %c0_4] : memref<1x128xf32, #tpu.memory_space<vmem>>, vector<1x128xf32>
    %4 = vector.broadcast %3 : vector<1x128xf32> to vector<16x128xf32>
    %5 = arith.addf %2, %4 : vector<16x128xf32>
    %cst_5 = arith.constant 0.000000e+00 : f32
    %6 = vector.broadcast %cst_5 : f32 to vector<16x128xf32>
    %7 = arith.maximumf %5, %6 : vector<16x128xf32>
    %c0_6 = arith.constant 0 : index
    %c0_7 = arith.constant 0 : index
    %8 = vector.load %arg4[%c0_6, %c0_7] : memref<128x128xf32, #tpu.memory_space<vmem>>, vector<128x128xf32>
    %cst_8 = arith.constant dense<0.000000e+00> : vector<16x128xf32>
    %9 = tpu.matmul %7, %8, %cst_8 {dimension_numbers = #tpu.dot_dimension_numbers<[1], [0], [0], [1], [0, 0, 1, 1], [], []>} : vector<16x128xf32>, vector<128x128xf32>, vector<16x128xf32> -> vector<16x128xf32>
    %c0_9 = arith.constant 0 : index
    %c0_10 = arith.constant 0 : index
    %10 = vector.load %arg5[%c0_9, %c0_10] : memref<1x128xf32, #tpu.memory_space<vmem>>, vector<1x128xf32>
    %11 = vector.broadcast %10 : vector<1x128xf32> to vector<16x128xf32>
    %12 = arith.addf %9, %11 : vector<16x128xf32>
    %cst_11 = arith.constant dense<0xFF800000> : vector<16xf32>
    %13 = vector.multi_reduction <maximumf>, %12, %cst_11 [1] : vector<16x128xf32> to vector<16xf32>
    %14 = vector.shape_cast %13 : vector<16xf32> to vector<16x1xf32>
    %15 = vector.broadcast %14 : vector<16x1xf32> to vector<16x128xf32>
    %16 = arith.subf %12, %15 : vector<16x128xf32>
    %17 = math.exp %16 : vector<16x128xf32>
    %cst_12 = arith.constant dense<0.000000e+00> : vector<16xf32>
    %18 = vector.multi_reduction <add>, %17, %cst_12 [1] : vector<16x128xf32> to vector<16xf32>
    %19 = vector.shape_cast %18 : vector<16xf32> to vector<16x1xf32>
    %20 = tpu.reciprocal %19 {approx = true} : vector<16x1xf32> -> vector<16x1xf32>
    %21 = arith.mulf %19, %20 : vector<16x1xf32>
    %cst_13 = arith.constant 2.000000e+00 : f32
    %22 = vector.broadcast %cst_13 : f32 to vector<16x1xf32>
    %23 = arith.subf %22, %21 : vector<16x1xf32>
    %24 = arith.mulf %20, %23 : vector<16x1xf32>
    %25 = vector.broadcast %24 : vector<16x1xf32> to vector<16x128xf32>
    %26 = arith.mulf %17, %25 : vector<16x128xf32>
    %c0_14 = arith.constant 0 : index
    %c0_15 = arith.constant 0 : index
    %27 = vector.load %arg6[%c0_14, %c0_15] : memref<16x128xf32, #tpu.memory_space<vmem>>, vector<16x128xf32>
    tpu.vector_store %arg6[%c0_14, %c0_15], %26 {strides = array<i32>} : memref<16x128xf32, #tpu.memory_space<vmem>>, vector<16x128xf32>,
    return
  }
  func.func @transform_0(%arg0: i32) -> (i32, i32) {
    %c0_i32 = arith.constant 0 : i32
    %c0_i32_0 = arith.constant 0 : i32
    return %arg0, %c0_i32 : i32, i32
  }
  func.func @transform_1(%arg0: i32) -> (i32, i32) {
    %c0_i32 = arith.constant 0 : i32
    %c0_i32_0 = arith.constant 0 : i32
    %c0_i32_1 = arith.constant 0 : i32
    return %c0_i32, %c0_i32_0 : i32, i32
  }
  func.func @transform_2(%arg0: i32) -> (i32, i32) {
    %c0_i32 = arith.constant 0 : i32
    %c0_i32_0 = arith.constant 0 : i32
    %c0_i32_1 = arith.constant 0 : i32
    return %c0_i32, %c0_i32_0 : i32, i32
  }
  func.func @transform_3(%arg0: i32) -> (i32, i32) {
    %c0_i32 = arith.constant 0 : i32
    %c0_i32_0 = arith.constant 0 : i32
    %c0_i32_1 = arith.constant 0 : i32
    return %c0_i32, %c0_i32_0 : i32, i32
  }
  func.func @transform_4(%arg0: i32) -> (i32, i32) {
    %c0_i32 = arith.constant 0 : i32
    %c0_i32_0 = arith.constant 0 : i32
    %c0_i32_1 = arith.constant 0 : i32
    return %c0_i32, %c0_i32_0 : i32, i32
  }
  func.func @transform_5(%arg0: i32) -> (i32, i32) {
    %c0_i32 = arith.constant 0 : i32
    %c0_i32_0 = arith.constant 0 : i32
    return %arg0, %c0_i32 : i32, i32
  }
}

</mosaic_0001>

<bundles_post_ra>
// kernel: tpu_custom_call.1
= control target key start
LH: loop header
LB: loop body
LE: loop exit
PB: predicated region body
PF: predicated region fallthrough
CT: control target
= control target key end

     0   :  { %10 = vsyncpa [#allocation3], 0  ;;  %s695_s0 = inlined_call_operand.hbm [shape: f32[16,128], index: 0, kind: input, shape index: {}]   ;;  %s696_s1 = inlined_call_operand.hbm [shape: f32[128,128], index: 1, kind: input, shape index: {}]   ;;  %s697_s2 = inlined_call_operand.vmem [shape: f32[1,128], index: 2, kind: input, shape index: {}]   ;;  %s698_s3 = inlined_call_operand.hbm [shape: f32[128,128], index: 3, kind: input, shape index: {}]   ;;  %s699_s4 = inlined_call_operand.vmem [shape: f32[1,128], index: 4, kind: input, shape index: {}]   ;;  %s700_s5 = inlined_call_operand.hbm [shape: f32[16,128], index: 5, kind: output, shape index: {}]  }
   0x1   :  { %11 = vsyncpa [#allocation6], 0 }
   0x2   :  { %12 = vsyncpa [#allocation4], 0  ;;  %s586_s18 = smov [#allocation5]   ;;  %s587_s20 = smov [#allocation2]  }
   0x3   :  { %s30_s19 = sshll.u32 %s586_s18, 4  ;;  %s18_s21 = sshll.u32 %s587_s20, 4  ;;  %s31_s19 = int_to_ptr.vmem [resolvable:$true] %s30_s19  ;;  %s622_s21 = int_to_ptr.vmem [resolvable:$true] %s18_s21 }
   0x4   :  { %s492_s24 = scalar_lea.hbm %s696_s1, 2048 }
   0x5   :  { %p493_p0 = scmp.ne.s32.totalorder %s696_s1, %s492_s24  ;;  %p496_p1 = scmp.lt.u32.totalorder %s492_s24, %s696_s1 }
   0x7   :  { %p498_p2 = pnand %p496_p1, %p493_p0 }
   0x9   :  { %501 = shalt.err (!%p498_p2)
}
   0xa   :  { %s502_s29 = scalar_lea.vmem %s31_s19, 2048  ;;  %p507_p4 = scmp.lt.s32.totalorder %s31_s19, %s31_s19 }
   0xb   :  { %p503_p3 = scmp.ne.s32.totalorder %s31_s19, %s502_s29  ;;  %p508_p5 = scmp.lt.s32.totalorder %s502_s29, %s502_s29 }
   0xd   :  { %p509_p6 = por %p508_p5, %p507_p4 }
   0xf   :  { %p510_p7 = pnand %p509_p6, %p503_p3 }
  0x11   :  { %513 = shalt.err (!%p510_p7)
}
  0x12   :  { %s588_s30 = smov 128   ;;  %s589_s6 = smov 8  }
  0x13   :  { %36 = dma.hbm_to_vmem [thread:$0]  %s696_s1, 2048, %s31_s19, [#allocation6], %s588_s30, %s588_s30, %s589_s6  }
  0x14   :  { %s514_s11 = scalar_lea.hbm %s695_s0, 256 }
  0x15   :  { %p515_p8 = scmp.ne.s32.totalorder %s695_s0, %s514_s11  ;;  %p518_p9 = scmp.lt.u32.totalorder %s514_s11, %s695_s0 }
  0x17   :  { %p520_p10 = pnand %p518_p9, %p515_p8 }
  0x19   :  { %523 = shalt.err (!%p520_p10)
}
  0x1a   :  { %s524_s16 = scalar_lea.vmem %s622_s21, 256  ;;  %p529_p12 = scmp.lt.s32.totalorder %s622_s21, %s622_s21 }
  0x1b   :  { %p525_p11 = scmp.ne.s32.totalorder %s622_s21, %s524_s16  ;;  %p530_p13 = scmp.lt.s32.totalorder %s524_s16, %s524_s16 }
  0x1d   :  { %p531_p0 = por %p530_p13, %p529_p12 }
  0x1f   :  { %p532_p1 = pnand %p531_p0, %p525_p11 }
  0x21   :  { %535 = shalt.err (!%p532_p1)
}
  0x22   :  { %24 = dma.hbm_to_vmem [thread:$0]  %s695_s0, 256, %s622_s21, [#allocation3], %s588_s30, %s588_s30, %s589_s6  }
  0x23   :  { %s590_s18 = smov [#allocation7]   ;;  %s536_s23 = scalar_lea.hbm %s698_s3, 2048 }
  0x24   :  { %s44_s19 = sshll.u32 %s590_s18, 4  ;;  %p537_p2 = scmp.ne.s32.totalorder %s698_s3, %s536_s23  ;;  %s45_s19 = int_to_ptr.vmem [resolvable:$true] %s44_s19 }
  0x25   :  { %p540_p3 = scmp.lt.u32.totalorder %s536_s23, %s698_s3 }
  0x27   :  { %p542_p4 = pnand %p540_p3, %p537_p2 }
  0x29   :  { %545 = shalt.err (!%p542_p4)
}
  0x2a   :  { %s546_s28 = scalar_lea.vmem %s45_s19, 2048  ;;  %p551_p6 = scmp.lt.s32.totalorder %s45_s19, %s45_s19 }
  0x2b   :  { %p547_p5 = scmp.ne.s32.totalorder %s45_s19, %s546_s28  ;;  %p552_p7 = scmp.lt.s32.totalorder %s546_s28, %s546_s28 }
  0x2d   :  { %p553_p8 = por %p552_p7, %p551_p6 }
  0x2f   :  { %p554_p9 = pnand %p553_p8, %p547_p5 }
  0x31   :  { %557 = shalt.err (!%p554_p9)
}
  0x32   :  { %50 = dma.hbm_to_vmem [thread:$0]  %s698_s3, 2048, %s45_s19, [#allocation6], %s588_s30, %s588_s30, %s589_s6  }
  0x33   :  { %580 = dma.done.wait [#allocation3], 256  }
  0x34   :  { %581 = vsyncadd [#allocation3], 4294967040 }
  0x35   :  { %582 = dma.done.wait [#allocation6], 4096  }
  0x36   :  { %583 = vsyncadd [#allocation6], 4294963200  ;;  %v64_v0 = vld [vmem:[#allocation5] sm:$0xff]  ;;  %v65_v1 = vld [vmem:[#allocation5 + $0x8] sm:$0xff] }
  0x37   :  { %v66_v2 = vld [vmem:[#allocation5 + $0x10] sm:$0xff]  ;;  %v414_v3 = vpack.c.bf16 %v65_v1, %v64_v0  ;;  %v67_v4 = vld [vmem:[#allocation5 + $0x18] sm:$0xff]  ;;  %v68_v6 = vld [vmem:[#allocation5 + $0x20] sm:$0xff] }
  0x38   :  { %v418_v5 = vpack.c.bf16 %v67_v4, %v66_v2  ;;  %v69_v7 = vld [vmem:[#allocation5 + $0x28] sm:$0xff]  ;;  %v70_v9 = vld [vmem:[#allocation5 + $0x30] sm:$0xff]  ;;  %v71_v10 = vld [vmem:[#allocation5 + $0x38] sm:$0xff] }
  0x39   :  { %415 = vmatprep.subr.bf16.mxu0 %v414_v3  ;;  %v422_v8 = vpack.c.bf16 %v69_v7, %v68_v6  ;;  %v62_v11 = vld [vmem:[#allocation2] sm:$0xff]  ;;  %v164_v12 = vld [vmem:[#allocation7] sm:$0xff]  ;;  %v165_v13 = vld [vmem:[#allocation7 + $0x8] sm:$0xff]  ;;  %v426_v20 = vpack.c.bf16 %v71_v10, %v70_v9 }
  0x3a   :  { %417 = vmatpush3.bf16.msra.mxu0 %v414_v3  ;;  %376 = vmatprep.mubr.f32.mxu0 %v62_v11  ;;  %v166_v14 = vld [vmem:[#allocation7 + $0x10] sm:$0xff]  ;;  %v446_v15 = vpack.c.bf16 %v165_v13, %v164_v12  ;;  %v167_v16 = vld [vmem:[#allocation7 + $0x18] sm:$0xff]  ;;  %v168_v18 = vld [vmem:[#allocation7 + $0x20] sm:$0xff] }
  0x3b   :  { %419 = vmatprep.subr.bf16.mxu0 %v418_v5  ;;  %v450_v17 = vpack.c.bf16 %v167_v16, %v166_v14  ;;  %v169_v19 = vld [vmem:[#allocation7 + $0x28] sm:$0xff]  ;;  %v72_v21 = vld [vmem:[#allocation5 + $0x40] sm:$0xff]  ;;  %v170_v24 = vld [vmem:[#allocation7 + $0x30] sm:$0xff] }
  0x3c   :  { %447 = vmatprep.subr.bf16.mxu1 %v446_v15  ;;  %v73_v22 = vld [vmem:[#allocation5 + $0x48] sm:$0xff]  ;;  %v454_v23 = vpack.c.bf16 %v169_v19, %v168_v18  ;;  %v171_v25 = vld [vmem:[#allocation7 + $0x38] sm:$0xff]  ;;  %v74_v27 = vld [vmem:[#allocation5 + $0x50] sm:$0xff] }
  0x3d   :  { %449 = vmatpush3.bf16.msra.mxu1 %v446_v15  ;;  %v430_v26 = vpack.c.bf16 %v73_v22, %v72_v21  ;;  %v75_v28 = vld [vmem:[#allocation5 + $0x58] sm:$0xff]  ;;  %v458_v29 = vpack.c.bf16 %v171_v25, %v170_v24  ;;  %v172_v30 = vld [vmem:[#allocation7 + $0x40] sm:$0xff]  ;;  %v173_v31 = vld [vmem:[#allocation7 + $0x48] sm:$0xff] }
  0x3e   :  { %421 = vmatpush3.bf16.msra.mxu0 %v418_v5  ;;  %451 = vmatprep.subr.bf16.mxu1 %v450_v17  ;;  %v434_v32 = vpack.c.bf16 %v75_v28, %v74_v27  ;;  %v76_v33 = vld [vmem:[#allocation5 + $0x60] sm:$0xff]  ;;  %v77_v34 = vld [vmem:[#allocation5 + $0x68] sm:$0xff]  ;;  %v462_v35 = vpack.c.bf16 %v173_v31, %v172_v30  ;;  %v174_v36 = vld [vmem:[#allocation7 + $0x50] sm:$0xff] }
  0x3f   :  { %423 = vmatprep.subr.bf16.mxu0 %v422_v8  ;;  %v175_v37 = vld [vmem:[#allocation7 + $0x58] sm:$0xff]  ;;  %v438_v38 = vpack.c.bf16 %v77_v34, %v76_v33  ;;  %v78_v39 = vld [vmem:[#allocation5 + $0x70] sm:$0xff]  ;;  %v176_v42 = vld [vmem:[#allocation7 + $0x60] sm:$0xff] }
  0x40   :  { %v79_v40 = vld [vmem:[#allocation5 + $0x78] sm:$0xff]  ;;  %v466_v41 = vpack.c.bf16 %v175_v37, %v174_v36  ;;  %v177_v43 = vld [vmem:[#allocation7 + $0x68] sm:$0xff]  ;;  %v178_v47 = vld [vmem:[#allocation7 + $0x70] sm:$0xff] }
  0x41   :  { %453 = vmatpush3.bf16.msra.mxu1 %v450_v17  ;;  %v442_v44 = vpack.c.bf16 %v79_v40, %v78_v39  ;;  %v470_v45 = vpack.c.bf16 %v177_v43, %v176_v42  ;;  %v63_v46 = vld [vmem:[#allocation2 + $0x8] sm:$0xff]  ;;  %v306_v50 = vld [vmem:[%s697_s2] ss:$0 sm:$0xff]  ;;  %s591_s2 = smov [#allocation8]  }
  0x42   :  { %425 = vmatpush3.bf16.msra.mxu0 %v422_v8  ;;  %455 = vmatprep.subr.bf16.mxu1 %v454_v23  ;;  %v179_v48 = vld [vmem:[#allocation7 + $0x78] sm:$0xff]  ;;  %v307_v57 = vld [vmem:[%s699_s4] ss:$0 sm:$0xff]  ;;  %s293_s4 = sshll.u32 %s591_s2, 4  ;;  %s294_s4 = int_to_ptr.vmem [resolvable:$true] %s293_s4 }
  0x43   :  { %427 = vmatprep.subr.bf16.mxu0 %v426_v20  ;;  %v474_v49 = vpack.c.bf16 %v179_v48, %v178_v47  ;;  %s558_s9 = scalar_lea.vmem %s294_s4, 256  ;;  %p563_p11 = scmp.lt.s32.totalorder %s294_s4, %s294_s4 }
  0x44   :  { %p559_p10 = scmp.ne.s32.totalorder %s294_s4, %s558_s9  ;;  %p564_p12 = scmp.lt.s32.totalorder %s558_s9, %s558_s9 }
  0x45   :  { %457 = vmatpush3.bf16.msra.mxu1 %v454_v23 }
  0x46   :  { %429 = vmatpush3.bf16.msra.mxu0 %v426_v20  ;;  %459 = vmatprep.subr.bf16.mxu1 %v458_v29  ;;  %p565_p13 = por %p564_p12, %p563_p11 }
  0x47   :  { %431 = vmatprep.subr.bf16.mxu0 %v430_v26 }
  0x48   :  { %p566_p0 = pnand %p565_p13, %p559_p10 }
  0x49   :  { %461 = vmatpush3.bf16.msra.mxu1 %v458_v29 }
  0x4a   :  { %433 = vmatpush3.bf16.msra.mxu0 %v430_v26  ;;  %463 = vmatprep.subr.bf16.mxu1 %v462_v35 }
  0x4b   :  { %435 = vmatprep.subr.bf16.mxu0 %v434_v32 }
  0x4d   :  { %465 = vmatpush3.bf16.msra.mxu1 %v462_v35 }
  0x4e   :  { %437 = vmatpush3.bf16.msra.mxu0 %v434_v32  ;;  %467 = vmatprep.subr.bf16.mxu1 %v466_v41 }
  0x4f   :  { %439 = vmatprep.subr.bf16.mxu0 %v438_v38 }
  0x51   :  { %469 = vmatpush3.bf16.msra.mxu1 %v466_v41 }
  0x52   :  { %441 = vmatpush3.bf16.msra.mxu0 %v438_v38  ;;  %471 = vmatprep.subr.bf16.mxu1 %v470_v45 }
  0x53   :  { %443 = vmatprep.subr.bf16.mxu0 %v442_v44 }
  0x55   :  { %473 = vmatpush3.bf16.msra.mxu1 %v470_v45 }
  0x56   :  { %445 = vmatpush3.bf16.msra.mxu0 %v442_v44  ;;  %475 = vmatprep.subr.bf16.mxu1 %v474_v49 }
  0x59   :  { %377 = vmatmul.mubr.f32.vlgmr.msra.gmra.mrb[0].mxu0 %v63_v46  ;;  %477 = vmatpush3.bf16.msra.mxu1 %v474_v49 }
 0x12c   :  { %v378_v51 = vpop.f32.mrb[0].mxu0 }
 0x12d   :  { %v159_v52 = vadd.f32 %v378_v51, %v306_v50  ;;  %v153_v53 = vpop.f32.mrb[1].mxu0 }
 0x12e   :  { %v154_v54 = vadd.f32 %v306_v50, %v153_v53 }
 0x12f   :  { %v163_v56 = vmax.f32 %v159_v52, 0.0 }
 0x130   :  { %v162_v55 = vmax.f32 %v154_v54, 0.0 }
 0x132   :  { %411 = vmatprep.mubr.f32.mxu1 %v162_v55 }
 0x133   :  { %412 = vmatmul.mubr.f32.vlgmr.msra.gmra.mrb[0].mxu1 %v163_v56 }
 0x206   :  { %v413_v58 = vpop.f32.mrb[0].mxu1 }
 0x207   :  { %v253_v59 = vpop.f32.mrb[1].mxu1  ;;  %v259_v61 = vadd.f32 %v413_v58, %v307_v57 }
 0x208   :  { %v254_v60 = vadd.f32 %v307_v57, %v253_v59 }
 0x20a   :  { %262 = vmax.xlane.f32.xlu0 %v254_v60 }
 0x20e   :  { %264 = vmax.xlane.f32.xlu0 %v259_v61 }
 0x297   :  { %v263_v62 = vpop.xlane.xlu0 %262 }
 0x298   :  { %v266_v63 = vsub.f32 %v254_v60, %v263_v62 }
 0x29a   :  { %v268_v0 = vmul.f32 1.442695, %v266_v63 }
 0x29b   :  { %v265_v1 = vpop.xlane.xlu0 %264 }
 0x29c   :  { %484 = vpow2.f32 %v268_v0  ;;  %v267_v2 = vsub.f32 %v259_v61, %v265_v1 }
 0x29e   :  { %v270_v3 = vmul.f32 1.442695, %v267_v2 }
 0x2a0   :  { %486 = vpow2.f32 %v270_v3 }
 0x2a6   :  { %v485_v4 = vpop.eup %484 }
 0x2a7   :  { %272 = vadd.xlane.f32.xlu1 %v485_v4 }
 0x2aa   :  { %v487_v5 = vpop.eup %486 }
 0x2ab   :  { %274 = vadd.xlane.f32.xlu1 %v487_v5 }
 0x334   :  { %v273_v6 = vpop.xlane.xlu1 %272 }
 0x335   :  { %488 = vrcp.f32 %v273_v6 }
 0x338   :  { %v275_v7 = vpop.xlane.xlu1 %274 }
 0x339   :  { %490 = vrcp.f32 %v275_v7 }
 0x33f   :  { %v489_v8 = vpop.eup %488 }
 0x340   :  { %v278_v9 = vmul.f32 %v489_v8, %v273_v6 }
 0x342   :  { %v280_v10 = vsub.f32 2.0, %v278_v9 }
 0x343   :  { %v491_v11 = vpop.eup %490 }
 0x344   :  { %v282_v12 = vmul.f32 %v489_v8, %v280_v10  ;;  %v279_v13 = vmul.f32 %v491_v11, %v275_v7 }
 0x346   :  { %v281_v14 = vsub.f32 2.0, %v279_v13  ;;  %v284_v15 = vmul.f32 %v485_v4, %v282_v12 }
 0x348   :  { %v283_v16 = vmul.f32 %v491_v11, %v281_v14  ;;  %286 = vst [vmem:[#allocation8] sm:$0xff] %v284_v15 }
 0x34a   :  { %v285_v17 = vmul.f32 %v487_v5, %v283_v16 }
 0x34c   :  { %287 = vst [vmem:[#allocation8 + $0x8] sm:$0xff] %v285_v17 }
 0x34d   :  { %569 = shalt.err (!%p566_p0)
}
 0x34e   :  { %s570_s12 = scalar_lea.hbm %s700_s5, 256 }
 0x34f   :  { %p571_p1 = scmp.ne.s32.totalorder %s700_s5, %s570_s12  ;;  %p574_p2 = scmp.lt.u32.totalorder %s570_s12, %s700_s5 }
 0x351   :  { %p576_p3 = pnand %p574_p2, %p571_p1 }
 0x353   :  { %579 = shalt.err (!%p576_p3)
}
 0x354   :  { %299 = dma.vmem_to_hbm [thread:$0]  %s294_s4, 256, %s700_s5, [#allocation4], %s588_s30, %s588_s30, %s589_s6  }
 0x355   :  { %584 = dma.done.wait [#allocation4], 256  }
 0x356   :  { %585 = vsyncadd [#allocation4], 4294967040 }
 0x357   :  { %303 = vsyncpa [#allocation3], 1 }
 0x358   :  { %304 = vsyncpa [#allocation6], 1 }
 0x359   :  { %305 = vsyncpa [#allocation4], 1 }

// kernel: tpu_custom_call.1
= control target key start
LH: loop header
LB: loop body
LE: loop exit
PB: predicated region body
PF: predicated region fallthrough
CT: control target
= control target key end

     0   :  { %10 = vsyncpa [#allocation3], 0  ;;  %s695_s0 = inlined_call_operand.hbm [shape: f32[16,128], index: 0, kind: input, shape index: {}]   ;;  %s696_s1 = inlined_call_operand.hbm [shape: f32[128,128], index: 1, kind: input, shape index: {}]   ;;  %s697_s2 = inlined_call_operand.vmem [shape: f32[1,128], index: 2, kind: input, shape index: {}]   ;;  %s698_s3 = inlined_call_operand.hbm [shape: f32[128,128], index: 3, kind: input, shape index: {}]   ;;  %s699_s4 = inlined_call_operand.vmem [shape: f32[1,128], index: 4, kind: input, shape index: {}]   ;;  %s700_s5 = inlined_call_operand.hbm [shape: f32[16,128], index: 5, kind: output, shape index: {}]  }
   0x1   :  { %11 = vsyncpa [#allocation6], 0 }
   0x2   :  { %12 = vsyncpa [#allocation4], 0  ;;  %s586_s18 = smov [#allocation5]   ;;  %s587_s20 = smov [#allocation2]  }
   0x3   :  { %s30_s19 = sshll.u32 %s586_s18, 4  ;;  %s18_s21 = sshll.u32 %s587_s20, 4  ;;  %s31_s19 = int_to_ptr.vmem [resolvable:$true] %s30_s19  ;;  %s622_s21 = int_to_ptr.vmem [resolvable:$true] %s18_s21 }
   0x4   :  { %s492_s24 = scalar_lea.hbm %s696_s1, 2048 }
   0x5   :  { %p493_p0 = scmp.ne.s32.totalorder %s696_s1, %s492_s24  ;;  %p496_p1 = scmp.lt.u32.totalorder %s492_s24, %s696_s1 }
   0x7   :  { %p498_p2 = pnand %p496_p1, %p493_p0 }
   0x9   :  { %501 = shalt.err (!%p498_p2)
}
   0xa   :  { %s502_s29 = scalar_lea.vmem %s31_s19, 2048  ;;  %p507_p4 = scmp.lt.s32.totalorder %s31_s19, %s31_s19 }
   0xb   :  { %p503_p3 = scmp.ne.s32.totalorder %s31_s19, %s502_s29  ;;  %p508_p5 = scmp.lt.s32.totalorder %s502_s29, %s502_s29 }
   0xd   :  { %p509_p6 = por %p508_p5, %p507_p4 }
   0xf   :  { %p510_p7 = pnand %p509_p6, %p503_p3 }
  0x11   :  { %513 = shalt.err (!%p510_p7)
}
  0x12   :  { %s588_s30 = smov 128   ;;  %s589_s6 = smov 8  }
  0x13   :  { %36 = dma.hbm_to_vmem [thread:$0]  %s696_s1, 2048, %s31_s19, [#allocation6], %s588_s30, %s588_s30, %s589_s6  }
  0x14   :  { %s514_s11 = scalar_lea.hbm %s695_s0, 256 }
  0x15   :  { %p515_p8 = scmp.ne.s32.totalorder %s695_s0, %s514_s11  ;;  %p518_p9 = scmp.lt.u32.totalorder %s514_s11, %s695_s0 }
  0x17   :  { %p520_p10 = pnand %p518_p9, %p515_p8 }
  0x19   :  { %523 = shalt.err (!%p520_p10)
}
  0x1a   :  { %s524_s16 = scalar_lea.vmem %s622_s21, 256  ;;  %p529_p12 = scmp.lt.s32.totalorder %s622_s21, %s622_s21 }
  0x1b   :  { %p525_p11 = scmp.ne.s32.totalorder %s622_s21, %s524_s16  ;;  %p530_p13 = scmp.lt.s32.totalorder %s524_s16, %s524_s16 }
  0x1d   :  { %p531_p0 = por %p530_p13, %p529_p12 }
  0x1f   :  { %p532_p1 = pnand %p531_p0, %p525_p11 }
  0x21   :  { %535 = shalt.err (!%p532_p1)
}
  0x22   :  { %24 = dma.hbm_to_vmem [thread:$0]  %s695_s0, 256, %s622_s21, [#allocation3], %s588_s30, %s588_s30, %s589_s6  }
  0x23   :  { %s590_s18 = smov [#allocation7]   ;;  %s536_s23 = scalar_lea.hbm %s698_s3, 2048 }
  0x24   :  { %s44_s19 = sshll.u32 %s590_s18, 4  ;;  %p537_p2 = scmp.ne.s32.totalorder %s698_s3, %s536_s23  ;;  %s45_s19 = int_to_ptr.vmem [resolvable:$true] %s44_s19 }
  0x25   :  { %p540_p3 = scmp.lt.u32.totalorder %s536_s23, %s698_s3 }
  0x27   :  { %p542_p4 = pnand %p540_p3, %p537_p2 }
  0x29   :  { %545 = shalt.err (!%p542_p4)
}
  0x2a   :  { %s546_s28 = scalar_lea.vmem %s45_s19, 2048  ;;  %p551_p6 = scmp.lt.s32.totalorder %s45_s19, %s45_s19 }
  0x2b   :  { %p547_p5 = scmp.ne.s32.totalorder %s45_s19, %s546_s28  ;;  %p552_p7 = scmp.lt.s32.totalorder %s546_s28, %s546_s28 }
  0x2d   :  { %p553_p8 = por %p552_p7, %p551_p6 }
  0x2f   :  { %p554_p9 = pnand %p553_p8, %p547_p5 }
  0x31   :  { %557 = shalt.err (!%p554_p9)
}
  0x32   :  { %50 = dma.hbm_to_vmem [thread:$0]  %s698_s3, 2048, %s45_s19, [#allocation6], %s588_s30, %s588_s30, %s589_s6  }
  0x33   :  { %580 = dma.done.wait [#allocation3], 256  }
  0x34   :  { %581 = vsyncadd [#allocation3], 4294967040 }
  0x35   :  { %582 = dma.done.wait [#allocation6], 4096  }
  0x36   :  { %583 = vsyncadd [#allocation6], 4294963200  ;;  %v64_v0 = vld [vmem:[#allocation5] sm:$0xff]  ;;  %v65_v1 = vld [vmem:[#allocation5 + $0x8] sm:$0xff] }
  0x37   :  { %v66_v2 = vld [vmem:[#allocation5 + $0x10] sm:$0xff]  ;;  %v414_v3 = vpack.c.bf16 %v65_v1, %v64_v0  ;;  %v67_v4 = vld [vmem:[#allocation5 + $0x18] sm:$0xff]  ;;  %v68_v6 = vld [vmem:[#allocation5 + $0x20] sm:$0xff] }
  0x38   :  { %v418_v5 = vpack.c.bf16 %v67_v4, %v66_v2  ;;  %v69_v7 = vld [vmem:[#allocation5 + $0x28] sm:$0xff]  ;;  %v70_v9 = vld [vmem:[#allocation5 + $0x30] sm:$0xff]  ;;  %v71_v10 = vld [vmem:[#allocation5 + $0x38] sm:$0xff] }
  0x39   :  { %415 = vmatprep.subr.bf16.mxu0 %v414_v3  ;;  %v422_v8 = vpack.c.bf16 %v69_v7, %v68_v6  ;;  %v62_v11 = vld [vmem:[#allocation2] sm:$0xff]  ;;  %v164_v12 = vld [vmem:[#allocation7] sm:$0xff]  ;;  %v165_v13 = vld [vmem:[#allocation7 + $0x8] sm:$0xff]  ;;  %v426_v20 = vpack.c.bf16 %v71_v10, %v70_v9 }
  0x3a   :  { %417 = vmatpush3.bf16.msra.mxu0 %v414_v3  ;;  %376 = vmatprep.mubr.f32.mxu0 %v62_v11  ;;  %v166_v14 = vld [vmem:[#allocation7 + $0x10] sm:$0xff]  ;;  %v446_v15 = vpack.c.bf16 %v165_v13, %v164_v12  ;;  %v167_v16 = vld [vmem:[#allocation7 + $0x18] sm:$0xff]  ;;  %v168_v18 = vld [vmem:[#allocation7 + $0x20] sm:$0xff] }
  0x3b   :  { %419 = vmatprep.subr.bf16.mxu0 %v418_v5  ;;  %v450_v17 = vpack.c.bf16 %v167_v16, %v166_v14  ;;  %v169_v19 = vld [vmem:[#allocation7 + $0x28] sm:$0xff]  ;;  %v72_v21 = vld [vmem:[#allocation5 + $0x40] sm:$0xff]  ;;  %v170_v24 = vld [vmem:[#allocation7 + $0x30] sm:$0xff] }
  0x3c   :  { %447 = vmatprep.subr.bf16.mxu1 %v446_v15  ;;  %v73_v22 = vld [vmem:[#allocation5 + $0x48] sm:$0xff]  ;;  %v454_v23 = vpack.c.bf16 %v169_v19, %v168_v18  ;;  %v171_v25 = vld [vmem:[#allocation7 + $0x38] sm:$0xff]  ;;  %v74_v27 = vld [vmem:[#allocation5 + $0x50] sm:$0xff] }
  0x3d   :  { %449 = vmatpush3.bf16.msra.mxu1 %v446_v15  ;;  %v430_v26 = vpack.c.bf16 %v73_v22, %v72_v21  ;;  %v75_v28 = vld [vmem:[#allocation5 + $0x58] sm:$0xff]  ;;  %v458_v29 = vpack.c.bf16 %v171_v25, %v170_v24  ;;  %v172_v30 = vld [vmem:[#allocation7 + $0x40] sm:$0xff]  ;;  %v173_v31 = vld [vmem:[#allocation7 + $0x48] sm:$0xff] }
  0x3e   :  { %421 = vmatpush3.bf16.msra.mxu0 %v418_v5  ;;  %451 = vmatprep.subr.bf16.mxu1 %v450_v17  ;;  %v434_v32 = vpack.c.bf16 %v75_v28, %v74_v27  ;;  %v76_v33 = vld [vmem:[#allocation5 + $0x60] sm:$0xff]  ;;  %v77_v34 = vld [vmem:[#allocation5 + $0x68] sm:$0xff]  ;;  %v462_v35 = vpack.c.bf16 %v173_v31, %v172_v30  ;;  %v174_v36 = vld [vmem:[#allocation7 + $0x50] sm:$0xff] }
  0x3f   :  { %423 = vmatprep.subr.bf16.mxu0 %v422_v8  ;;  %v175_v37 = vld [vmem:[#allocation7 + $0x58] sm:$0xff]  ;;  %v438_v38 = vpack.c.bf16 %v77_v34, %v76_v33  ;;  %v78_v39 = vld [vmem:[#allocation5 + $0x70] sm:$0xff]  ;;  %v176_v42 = vld [vmem:[#allocation7 + $0x60] sm:$0xff] }
  0x40   :  { %v79_v40 = vld [vmem:[#allocation5 + $0x78] sm:$0xff]  ;;  %v466_v41 = vpack.c.bf16 %v175_v37, %v174_v36  ;;  %v177_v43 = vld [vmem:[#allocation7 + $0x68] sm:$0xff]  ;;  %v178_v47 = vld [vmem:[#allocation7 + $0x70] sm:$0xff] }
  0x41   :  { %453 = vmatpush3.bf16.msra.mxu1 %v450_v17  ;;  %v442_v44 = vpack.c.bf16 %v79_v40, %v78_v39  ;;  %v470_v45 = vpack.c.bf16 %v177_v43, %v176_v42  ;;  %v63_v46 = vld [vmem:[#allocation2 + $0x8] sm:$0xff]  ;;  %v306_v50 = vld [vmem:[%s697_s2] ss:$0 sm:$0xff]  ;;  %s591_s2 = smov [#allocation8]  }
  0x42   :  { %425 = vmatpush3.bf16.msra.mxu0 %v422_v8  ;;  %455 = vmatprep.subr.bf16.mxu1 %v454_v23  ;;  %v179_v48 = vld [vmem:[#allocation7 + $0x78] sm:$0xff]  ;;  %v307_v57 = vld [vmem:[%s699_s4] ss:$0 sm:$0xff]  ;;  %s293_s4 = sshll.u32 %s591_s2, 4  ;;  %s294_s4 = int_to_ptr.vmem [resolvable:$true] %s293_s4 }
  0x43   :  { %427 = vmatprep.subr.bf16.mxu0 %v426_v20  ;;  %v474_v49 = vpack.c.bf16 %v179_v48, %v178_v47  ;;  %s558_s9 = scalar_lea.vmem %s294_s4, 256  ;;  %p563_p11 = scmp.lt.s32.totalorder %s294_s4, %s294_s4 }
  0x44   :  { %p559_p10 = scmp.ne.s32.totalorder %s294_s4, %s558_s9  ;;  %p564_p12 = scmp.lt.s32.totalorder %s558_s9, %s558_s9 }
  0x45   :  { %457 = vmatpush3.bf16.msra.mxu1 %v454_v23 }
  0x46   :  { %429 = vmatpush3.bf16.msra.mxu0 %v426_v20  ;;  %459 = vmatprep.subr.bf16.mxu1 %v458_v29  ;;  %p565_p13 = por %p564_p12, %p563_p11 }
  0x47   :  { %431 = vmatprep.subr.bf16.mxu0 %v430_v26 }
  0x48   :  { %p566_p0 = pnand %p565_p13, %p559_p10 }
  0x49   :  { %461 = vmatpush3.bf16.msra.mxu1 %v458_v29 }
  0x4a   :  { %433 = vmatpush3.bf16.msra.mxu0 %v430_v26  ;;  %463 = vmatprep.subr.bf16.mxu1 %v462_v35 }
  0x4b   :  { %435 = vmatprep.subr.bf16.mxu0 %v434_v32 }
  0x4d   :  { %465 = vmatpush3.bf16.msra.mxu1 %v462_v35 }
  0x4e   :  { %437 = vmatpush3.bf16.msra.mxu0 %v434_v32  ;;  %467 = vmatprep.subr.bf16.mxu1 %v466_v41 }
  0x4f   :  { %439 = vmatprep.subr.bf16.mxu0 %v438_v38 }
  0x51   :  { %469 = vmatpush3.bf16.msra.mxu1 %v466_v41 }
  0x52   :  { %441 = vmatpush3.bf16.msra.mxu0 %v438_v38  ;;  %471 = vmatprep.subr.bf16.mxu1 %v470_v45 }
  0x53   :  { %443 = vmatprep.subr.bf16.mxu0 %v442_v44 }
  0x55   :  { %473 = vmatpush3.bf16.msra.mxu1 %v470_v45 }
  0x56   :  { %445 = vmatpush3.bf16.msra.mxu0 %v442_v44  ;;  %475 = vmatprep.subr.bf16.mxu1 %v474_v49 }
  0x59   :  { %377 = vmatmul.mubr.f32.vlgmr.msra.gmra.mrb[0].mxu0 %v63_v46  ;;  %477 = vmatpush3.bf16.msra.mxu1 %v474_v49 }
 0x12c   :  { %v378_v51 = vpop.f32.mrb[0].mxu0 }
 0x12d   :  { %v159_v52 = vadd.f32 %v378_v51, %v306_v50  ;;  %v153_v53 = vpop.f32.mrb[1].mxu0 }
 0x12e   :  { %v154_v54 = vadd.f32 %v306_v50, %v153_v53 }
 0x12f   :  { %v163_v56 = vmax.f32 %v159_v52, 0.0 }
 0x130   :  { %v162_v55 = vmax.f32 %v154_v54, 0.0 }
 0x132   :  { %411 = vmatprep.mubr.f32.mxu1 %v162_v55 }
 0x133   :  { %412 = vmatmul.mubr.f32.vlgmr.msra.gmra.mrb[0].mxu1 %v163_v56 }
 0x206   :  { %v413_v58 = vpop.f32.mrb[0].mxu1 }
 0x207   :  { %v253_v59 = vpop.f32.mrb[1].mxu1  ;;  %v259_v61 = vadd.f32 %v413_v58, %v307_v57 }
 0x208   :  { %v254_v60 = vadd.f32 %v307_v57, %v253_v59 }
 0x20a   :  { %262 = vmax.xlane.f32.xlu0 %v254_v60 }
 0x20e   :  { %264 = vmax.xlane.f32.xlu0 %v259_v61 }
 0x297   :  { %v263_v62 = vpop.xlane.xlu0 %262 }
 0x298   :  { %v266_v63 = vsub.f32 %v254_v60, %v263_v62 }
 0x29a   :  { %v268_v0 = vmul.f32 1.442695, %v266_v63 }
 0x29b   :  { %v265_v1 = vpop.xlane.xlu0 %264 }
 0x29c   :  { %484 = vpow2.f32 %v268_v0  ;;  %v267_v2 = vsub.f32 %v259_v61, %v265_v1 }
 0x29e   :  { %v270_v3 = vmul.f32 1.442695, %v267_v2 }
 0x2a0   :  { %486 = vpow2.f32 %v270_v3 }
 0x2a6   :  { %v485_v4 = vpop.eup %484 }
 0x2a7   :  { %272 = vadd.xlane.f32.xlu1 %v485_v4 }
 0x2aa   :  { %v487_v5 = vpop.eup %486 }
 0x2ab   :  { %274 = vadd.xlane.f32.xlu1 %v487_v5 }
 0x334   :  { %v273_v6 = vpop.xlane.xlu1 %272 }
 0x335   :  { %488 = vrcp.f32 %v273_v6 }
 0x338   :  { %v275_v7 = vpop.xlane.xlu1 %274 }
 0x339   :  { %490 = vrcp.f32 %v275_v7 }
 0x33f   :  { %v489_v8 = vpop.eup %488 }
 0x340   :  { %v278_v9 = vmul.f32 %v489_v8, %v273_v6 }
 0x342   :  { %v280_v10 = vsub.f32 2.0, %v278_v9 }
 0x343   :  { %v491_v11 = vpop.eup %490 }
 0x344   :  { %v282_v12 = vmul.f32 %v489_v8, %v280_v10  ;;  %v279_v13 = vmul.f32 %v491_v11, %v275_v7 }
 0x346   :  { %v281_v14 = vsub.f32 2.0, %v279_v13  ;;  %v284_v15 = vmul.f32 %v485_v4, %v282_v12 }
 0x348   :  { %v283_v16 = vmul.f32 %v491_v11, %v281_v14  ;;  %286 = vst [vmem:[#allocation8] sm:$0xff] %v284_v15 }
 0x34a   :  { %v285_v17 = vmul.f32 %v487_v5, %v283_v16 }
 0x34c   :  { %287 = vst [vmem:[#allocation8 + $0x8] sm:$0xff] %v285_v17 }
 0x34d   :  { %569 = shalt.err (!%p566_p0)
}
 0x34e   :  { %s570_s12 = scalar_lea.hbm %s700_s5, 256 }
 0x34f   :  { %p571_p1 = scmp.ne.s32.totalorder %s700_s5, %s570_s12  ;;  %p574_p2 = scmp.lt.u32.totalorder %s570_s12, %s700_s5 }
 0x351   :  { %p576_p3 = pnand %p574_p2, %p571_p1 }
 0x353   :  { %579 = shalt.err (!%p576_p3)
}
 0x354   :  { %299 = dma.vmem_to_hbm [thread:$0]  %s294_s4, 256, %s700_s5, [#allocation4], %s588_s30, %s588_s30, %s589_s6  }
 0x355   :  { %584 = dma.done.wait [#allocation4], 256  }
 0x356   :  { %585 = vsyncadd [#allocation4], 4294967040 }
 0x357   :  { %303 = vsyncpa [#allocation3], 1 }
 0x358   :  { %304 = vsyncpa [#allocation6], 1 }
 0x359   :  { %305 = vsyncpa [#allocation4], 1 }

</bundles_post_ra>
